<compile_context>
chip_gen: v5e
topology: v5e:2x2
jax: 0.10.0
libtpu: 0.0.40
codegen_flags: <defaults>
</compile_context>

<pallas_src>
import functools

import numpy as np
import jax
import jax.numpy as jnp
from jax import lax
from jax.experimental import pallas as pl
from jax.experimental.pallas import tpu as pltpu


def _convt_kernel(x_ref, s_ref, w_ref, b_ref, o_ref, *, n_taps, outp):
    # x_ref : (N*Ci, HW)          f32   activations (free reshape of NCHW)
    # s_ref : (HW, n_taps*outp)   int8  0/1 col2im scatter, taps along columns
    # w_ref : (N*CG, n_taps*N*Ci) f32   block-diag-in-batch weights
    # b_ref : (N*CG, 1)           f32   bias per (n, co) row (zeros in pad rows)
    # o_ref : (N*CG, outp)        f32   lane/sublane-dense output
    s = s_ref[...].astype(jnp.float32)                  # int8 -> f32 (VPU), exact
    # Matmul 1: place every input pixel of every (batch, channel) row at its
    # transposed-conv output location, for all taps at once.  (N*Ci, T*outp)
    z = jnp.dot(x_ref[...], s, preferred_element_type=jnp.float32)
    # Restack the tap column-blocks onto rows: slices are 2-vreg (256-lane)
    # aligned -> pure vreg moves, no lane crossing.   (T*N*Ci, outp)
    zcat = jnp.concatenate(
        [z[:, t * outp:(t + 1) * outp] for t in range(n_taps)], axis=0)
    # Matmul 2: tap reduction + channel contraction for BOTH batches, K=T*N*Ci.
    y = jnp.dot(w_ref[...], zcat, preferred_element_type=jnp.float32)
    y = y + b_ref[...]
    o_ref[...] = jnp.maximum(y, 0.5 * y).astype(o_ref.dtype)


def _scatter_cols(H, W, HO, WO, KH, KW, s, p, d, outp):
    """Scols[ih*W+iw, t*outp + oh*WO+ow] = 1 iff tap t of (ih,iw) lands on (oh,ow).

    Exact ConvTranspose2d index math: oh = ih*s - p + kh*d, ow = iw*s - p + kw*d.
    Output columns per tap are zero-padded to `outp` (lane-dense stores); stored
    as int8 (0/1) so the f32 matmul stays exact while HBM traffic drops 4x.
    """
    S = np.zeros((H * W, KH * KW * outp), np.int8)
    for kh in range(KH):
        for kw in range(KW):
            t = kh * KW + kw
            for ih in range(H):
                oh = ih * s - p + kh * d
                if oh < 0 or oh >= HO:
                    continue
                for iw in range(W):
                    ow = iw * s - p + kw * d
                    if ow < 0 or ow >= WO:
                        continue
                    S[ih * W + iw, t * outp + oh * WO + ow] = 1
    return S


@functools.partial(jax.jit, static_argnames=("stride", "padding", "dilation"))
def conv_transpose_leaky(x_nchw, weight, bias, *, stride, padding, dilation):
    """x_nchw: (N, Ci, H, W) f32; weight: (Ci, Co, kH, kW); bias: (Co,)."""
    N, Ci, H, W = x_nchw.shape
    Ci_w, Co, KH, KW = weight.shape
    assert Ci == Ci_w
    s, p, d = stride, padding, dilation

    # ConvTranspose2d output size (output_padding = 0).
    HO = (H - 1) * s - 2 * p + d * (KH - 1) + 1
    WO = (W - 1) * s - 2 * p + d * (KW - 1) + 1
    assert HO > 0 and WO > 0
    T = KH * KW
    HW, OUT = H * W, HO * WO
    OUTP = ((OUT + 127) // 128) * 128        # lane-dense output width
    CG = ((Co + 7) // 8) * 8                 # sublane-dense channel group

    # Free contiguous reshape of NCHW — no transposes, no zero-insertion.
    x2 = x_nchw.reshape(N * Ci, HW)

    # Trace-time int8 scatter constant (all taps stacked on columns).
    s_cols = jnp.asarray(_scatter_cols(H, W, HO, WO, KH, KW, s, p, d, OUTP))

    # One-time tiny weight prep: (Ci,Co,kh,kw) -> (T, CG, Ci) zero-padded, then
    # block-diagonal in the batch index so one K = T*N*Ci matmul computes both
    # batches' tap + channel reduction:  Wbig[(n,co),(t,n',ci)] = W_t[co,ci]*d(n,n')
    w_t = jnp.transpose(weight, (2, 3, 1, 0)).reshape(T, Co, Ci)
    w_t = jnp.pad(w_t, ((0, 0), (0, CG - Co), (0, 0)))
    eye = jnp.eye(N, dtype=weight.dtype)
    w_big = jnp.einsum('tkc,nm->nktmc', w_t, eye).reshape(N * CG, T * N * Ci)

    b_big = jnp.tile(jnp.pad(bias, (0, CG - Co)), (N,)).reshape(N * CG, 1)

    kern = functools.partial(_convt_kernel, n_taps=T, outp=OUTP)

    out = pl.pallas_call(
        kern,
        out_shape=jax.ShapeDtypeStruct((N * CG, OUTP), x_nchw.dtype),
        grid=(1,),                           # single fused step: whole problem
        in_specs=[
            pl.BlockSpec((N * Ci, HW), lambda i: (0, 0)),
            pl.BlockSpec((HW, T * OUTP), lambda i: (0, 0)),
            pl.BlockSpec((N * CG, T * N * Ci), lambda i: (0, 0)),
            pl.BlockSpec((N * CG, 1), lambda i: (0, 0)),
        ],
        out_specs=pl.BlockSpec((N * CG, OUTP), lambda i: (0, 0)),
        compiler_params=pltpu.CompilerParams(
            dimension_semantics=("arbitrary",)),
    )(x2, s_cols, w_big, b_big)

    # Crop padded channels/lanes; contiguous reshape back to NCHW.
    return out.reshape(N, CG, OUTP)[:, :Co, :OUT].reshape(N, Co, HO, WO)


def _reference(x_nchw, weight, bias, *, stride, padding, dilation):
    """Pure-JAX reference for ConvTranspose2d + leaky elementwise."""
    Ci, Co, KH, KW = weight.shape
    s, p, d = stride, padding, dilation
    w_flip = jnp.transpose(weight[:, :, ::-1, ::-1], (1, 0, 2, 3))  # (Co,Ci,kh,kw)
    y = lax.conv_general_dilated(
        x_nchw, w_flip,
        window_strides=(1, 1),
        padding=[(d * (KH - 1) - p, d * (KH - 1) - p),
                 (d * (KW - 1) - p, d * (KW - 1) - p)],
        lhs_dilation=(s, s),
        rhs_dilation=(d, d),
        dimension_numbers=("NCHW", "OIHW", "NCHW"))
    y = y + bias[None, :, None, None]
    return jnp.where(y > 0, y, y * 0.5)


if __name__ == "__main__":
    STRIDE, PADDING, DILATION = 2, 1, 1
    # Small shapes consistent with the module (conv in_channels must match x).
    N, CI, H, W = 2, 16, 8, 8
    CO, K = 7, 2

    key = jax.random.PRNGKey(0)
    kx, kw_, kb = jax.random.split(key, 3)
    x = jax.random.normal(kx, (N, CI, H, W), jnp.float32)
    # PyTorch-shaped params: weight (Ci, Co, kH, kW), bias (Co,)
    bound = 1.0 / (CI * K * K) ** 0.5
    weight = jax.random.uniform(kw_, (CI, CO, K, K), jnp.float32, -bound, bound)
    bias = jax.random.uniform(kb, (CO,), jnp.float32, -bound, bound)

    out = conv_transpose_leaky(x, weight, bias,
                               stride=STRIDE, padding=PADDING, dilation=DILATION)
    out = jax.block_until_ready(out)

    ref = _reference(x, weight, bias,
                     stride=STRIDE, padding=PADDING, dilation=DILATION)
    assert out.shape == ref.shape, (out.shape, ref.shape)
    assert jnp.allclose(out, ref, atol=1e-4, rtol=1e-4), \
        float(jnp.max(jnp.abs(out - ref)))

    print("KERNEL_OK")
</pallas_src>

<mosaic_0001>
module attributes {stable_mosaic.version = 11 : i64} {
  func.func @_convt_kernel(%arg0: i32, %arg1: memref<32x64xf32, #tpu.memory_space<vmem>>, %arg2: memref<64x1024xi8, #tpu.memory_space<vmem>>, %arg3: memref<16x128xf32, #tpu.memory_space<vmem>>, %arg4: memref<16x1xf32, #tpu.memory_space<vmem>>, %arg5: memref<16x256xf32, #tpu.memory_space<vmem>>) attributes {dimension_semantics = [#tpu.dimension_semantics<arbitrary>], iteration_bounds = array<i64: 1>, scalar_prefetch = 0 : i64, scratch_operands = 0 : i64, tpu.core_type = #tpu.core_type<tc>, window_params = [{pipeline_mode = #tpu.pipeline_mode<synchronous>, transform_indices = @transform_0, window_bounds = array<i64: 32, 64>}, {pipeline_mode = #tpu.pipeline_mode<synchronous>, transform_indices = @transform_1, window_bounds = array<i64: 64, 1024>}, {pipeline_mode = #tpu.pipeline_mode<synchronous>, transform_indices = @transform_2, window_bounds = array<i64: 16, 128>}, {pipeline_mode = #tpu.pipeline_mode<synchronous>, transform_indices = @transform_3, window_bounds = array<i64: 16, 1>}, {pipeline_mode = #tpu.pipeline_mode<synchronous>, transform_indices = @transform_4, window_bounds = array<i64: 16, 256>}]} {
    %c0 = arith.constant 0 : index
    %c0_0 = arith.constant 0 : index
    %0 = vector.load %arg2[%c0, %c0_0] : memref<64x1024xi8, #tpu.memory_space<vmem>>, vector<64x1024xi8>
    %1 = arith.sitofp %0 : vector<64x1024xi8> to vector<64x1024xf32>
    %c0_1 = arith.constant 0 : index
    %c0_2 = arith.constant 0 : index
    %2 = vector.load %arg1[%c0_1, %c0_2] : memref<32x64xf32, #tpu.memory_space<vmem>>, vector<32x64xf32>
    %cst = arith.constant dense<0.000000e+00> : vector<32x1024xf32>
    %3 = tpu.matmul %2, %1, %cst {dimension_numbers = #tpu.dot_dimension_numbers<[1], [0], [0], [1], [0, 0, 1, 1], [], []>} : vector<32x64xf32>, vector<64x1024xf32>, vector<32x1024xf32> -> vector<32x1024xf32>
    %4 = vector.extract_strided_slice %3 {offsets = [0, 0], sizes = [32, 256], strides = [1, 1]} : vector<32x1024xf32> to vector<32x256xf32>
    %5 = vector.extract_strided_slice %3 {offsets = [0, 256], sizes = [32, 256], strides = [1, 1]} : vector<32x1024xf32> to vector<32x256xf32>
    %6 = vector.extract_strided_slice %3 {offsets = [0, 512], sizes = [32, 256], strides = [1, 1]} : vector<32x1024xf32> to vector<32x256xf32>
    %7 = vector.extract_strided_slice %3 {offsets = [0, 768], sizes = [32, 256], strides = [1, 1]} : vector<32x1024xf32> to vector<32x256xf32>
    %8 = tpu.concatenate %4, %5, %6, %7 in 0 : vector<32x256xf32>, vector<32x256xf32>, vector<32x256xf32>, vector<32x256xf32> -> vector<128x256xf32>
    %c0_3 = arith.constant 0 : index
    %c0_4 = arith.constant 0 : index
    %9 = vector.load %arg3[%c0_3, %c0_4] : memref<16x128xf32, #tpu.memory_space<vmem>>, vector<16x128xf32>
    %cst_5 = arith.constant dense<0.000000e+00> : vector<16x256xf32>
    %10 = tpu.matmul %9, %8, %cst_5 {dimension_numbers = #tpu.dot_dimension_numbers<[1], [0], [0], [1], [0, 0, 1, 1], [], []>} : vector<16x128xf32>, vector<128x256xf32>, vector<16x256xf32> -> vector<16x256xf32>
    %c0_6 = arith.constant 0 : index
    %c0_7 = arith.constant 0 : index
    %11 = vector.load %arg4[%c0_6, %c0_7] : memref<16x1xf32, #tpu.memory_space<vmem>>, vector<16x1xf32>
    %12 = vector.broadcast %11 : vector<16x1xf32> to vector<16x256xf32>
    %13 = arith.addf %10, %12 : vector<16x256xf32>
    %cst_8 = arith.constant 5.000000e-01 : f32
    %14 = vector.broadcast %cst_8 : f32 to vector<16x256xf32>
    %15 = arith.mulf %14, %13 : vector<16x256xf32>
    %16 = arith.maximumf %13, %15 : vector<16x256xf32>
    %c0_9 = arith.constant 0 : index
    %c0_10 = arith.constant 0 : index
    %17 = vector.load %arg5[%c0_9, %c0_10] : memref<16x256xf32, #tpu.memory_space<vmem>>, vector<16x256xf32>
    tpu.vector_store %arg5[%c0_9, %c0_10], %16 {strides = array<i32>} : memref<16x256xf32, #tpu.memory_space<vmem>>, vector<16x256xf32>,
    return
  }
  func.func @transform_0(%arg0: i32) -> (i32, i32) {
    %c0_i32 = arith.constant 0 : i32
    %c0_i32_0 = arith.constant 0 : i32
    %c0_i32_1 = arith.constant 0 : i32
    return %c0_i32, %c0_i32_0 : i32, i32
  }
  func.func @transform_1(%arg0: i32) -> (i32, i32) {
    %c0_i32 = arith.constant 0 : i32
    %c0_i32_0 = arith.constant 0 : i32
    %c0_i32_1 = arith.constant 0 : i32
    return %c0_i32, %c0_i32_0 : i32, i32
  }
  func.func @transform_2(%arg0: i32) -> (i32, i32) {
    %c0_i32 = arith.constant 0 : i32
    %c0_i32_0 = arith.constant 0 : i32
    %c0_i32_1 = arith.constant 0 : i32
    return %c0_i32, %c0_i32_0 : i32, i32
  }
  func.func @transform_3(%arg0: i32) -> (i32, i32) {
    %c0_i32 = arith.constant 0 : i32
    %c0_i32_0 = arith.constant 0 : i32
    %c0_i32_1 = arith.constant 0 : i32
    return %c0_i32, %c0_i32_0 : i32, i32
  }
  func.func @transform_4(%arg0: i32) -> (i32, i32) {
    %c0_i32 = arith.constant 0 : i32
    %c0_i32_0 = arith.constant 0 : i32
    %c0_i32_1 = arith.constant 0 : i32
    return %c0_i32, %c0_i32_0 : i32, i32
  }
}

</mosaic_0001>

<bundles_post_ra>
// kernel: tile.0
= control target key start
LH: loop header
LB: loop body
LE: loop exit
PB: predicated region body
PF: predicated region fallthrough
CT: control target
= control target key end

     0   :  { %s66_s8 = smov 125   ;;  %s67_s9 = smov 123   ;;  %vm7_vm0 = vcmask 7168   ;;  %s117_s0 = inlined_call_operand.vmem [shape: f32[2,8], index: 0, kind: input, shape index: {}]   ;;  %s118_s1 = inlined_call_operand.vmem [shape: f32[16,1], index: 1, kind: output, shape index: {}]  }
   0x1   :  { %v4_v0 = vld [vmem:[%s117_s0] sm:$0x3]  ;;  %s65_s0 = smov 127   ;;  %s68_s10 = smov 126  }
   0x2   :  { %5 = vst [vmem:[#allocation0] sm:$0x3] %v4_v0  ;;  %s69_s11 = smov 124   ;;  %s70_s12 = smov 122  }
   0x3   :  { %s71_s13 = smov 121  }
   0x9   :  { %v9_v1 = vld [vmem:[#allocation0] sm:$0x3]  }
   0xa   :  { %v21_v2 = vld [vmem:[#allocation0] sm:$0x3]   ;;  %10 = vrot.lane.b32.xlu0 %v9_v1, %s65_s0 }
   0xb   :  { %22 = vrot.lane.b32.xlu1 %v21_v2, %s66_s8  ;;  %v33_v3 = vld [vmem:[#allocation0] sm:$0x3]  }
   0xc   :  { %34 = vrot.lane.b32.xlu2 %v33_v3, %s67_s9  ;;  %v15_v4 = vld [vmem:[#allocation0] sm:$0x3]  }
   0xd   :  { %v27_v5 = vld [vmem:[#allocation0] sm:$0x3]  }
   0xe   :  { %v39_v6 = vld [vmem:[#allocation0] sm:$0x3]  }
   0xf   :  { %v45_v7 = vld [vmem:[#allocation0] sm:$0x3]  }
  0x10   :  { %v6_v8 = vld [vmem:[#allocation0] sm:$0x3]  }
  0x11   :  { %8 = vst.msk [vmem:[%s118_s1] ss:$8 sm:$0x3] %vm7_vm0, %v6_v8  }
  0x12   :  { %16 = vrot.lane.b32.xlu0 %v15_v4, %s68_s10 }
  0x13   :  { %28 = vrot.lane.b32.xlu1 %v27_v5, %s69_s11 }
  0x14   :  { %40 = vrot.lane.b32.xlu2 %v39_v6, %s70_s12 }
  0x1a   :  { %46 = vrot.lane.b32.xlu0 %v45_v7, %s71_s13 }
  0x66   :  { %v35_v9 = vpop.permute.xlu2 %34  }
  0x67   :  { %55 = vst.msk [vmem:[%s118_s1 + $0x5] ss:$8 sm:$0x3] %vm7_vm0, %v35_v9  }
  0x6e   :  { %v41_v10 = vpop.permute.xlu2 %40  }
  0x6f   :  { %56 = vst.msk [vmem:[%s118_s1 + $0x6] ss:$8 sm:$0x3] %vm7_vm0, %v41_v10  }
  0x7c   :  { %v11_v11 = vpop.permute.xlu0 %10  }
  0x7d   :  { %v23_v12 = vpop.permute.xlu1 %22   ;;  %51 = vst.msk [vmem:[%s118_s1 + $0x1] ss:$8 sm:$0x3] %vm7_vm0, %v11_v11  }
  0x7e   :  { %53 = vst.msk [vmem:[%s118_s1 + $0x3] ss:$8 sm:$0x3] %vm7_vm0, %v23_v12  }
  0x84   :  { %v17_v13 = vpop.permute.xlu0 %16  }
  0x85   :  { %v29_v14 = vpop.permute.xlu1 %28   ;;  %52 = vst.msk [vmem:[%s118_s1 + $0x2] ss:$8 sm:$0x3] %vm7_vm0, %v17_v13  }
  0x86   :  { %54 = vst.msk [vmem:[%s118_s1 + $0x4] ss:$8 sm:$0x3] %vm7_vm0, %v29_v14  }
  0x8c   :  { %v47_v15 = vpop.permute.xlu0 %46  }
  0x8d   :  { %57 = vst.msk [vmem:[%s118_s1 + $0x7] ss:$8 sm:$0x3] %vm7_vm0, %v47_v15  }

// kernel: tile.8
= control target key start
LH: loop header
LB: loop body
LE: loop exit
PB: predicated region body
PF: predicated region fallthrough
CT: control target
= control target key end

     0   :  { %s22_s0 = inlined_call_operand.vmem [shape: f32[8], index: 0, kind: input, shape index: {}]   ;;  %s23_s1 = inlined_call_operand.vmem [shape: f32[2,8], index: 1, kind: output, shape index: {}]  }
   0x1   :  { %v4_v0 = vld [vmem:[%s22_s0] ss:$0 sm:$0xff] }
   0x2   :  { %5 = vst [vmem:[%s23_s1] sm:$0x3] %v4_v0 }

// kernel: conv_transpose_leaky.1
= control target key start
LH: loop header
LB: loop body
LE: loop exit
PB: predicated region body
PF: predicated region fallthrough
CT: control target
= control target key end

     0   :  { %vm165_vm0 = vcmask 523264   ;;  %s820_s1 = inlined_call_operand.vmem [shape: s8[64,1024], index: 1, kind: input, shape index: {}]   ;;  %s821_s0 = inlined_call_operand.vmem [shape: f32[32,64], index: 0, kind: input, shape index: {}]   ;;  %s822_s2 = inlined_call_operand.vmem [shape: f32[16,128], index: 2, kind: input, shape index: {}]   ;;  %s823_s3 = inlined_call_operand.vmem [shape: f32[16,1], index: 3, kind: input, shape index: {}]   ;;  %s824_s4 = inlined_call_operand.vmem [shape: f32[16,256], index: 4, kind: output, shape index: {}]  }
   0x1   :  { %v27_v0 = vld [vmem:[%s820_s1 + $0x50] sm:$0xff]  ;;  %v28_v1 = vld [vmem:[%s820_s1 + $0x58] sm:$0xff]  ;;  %v25_v16 = vld [vmem:[%s820_s1 + $0x40] sm:$0xff] }
   0x2   :  { %v91_v2 = vunpack.c.3.s8 %v27_v0  ;;  %v92_v3 = vunpack.c.3.s8 %v28_v1  ;;  %v83_v4 = vunpack.c.2.s8 %v27_v0  ;;  %v84_v5 = vunpack.c.2.s8 %v28_v1  ;;  %v19_v10 = vld [vmem:[%s820_s1 + $0x10] sm:$0xff]  ;;  %v20_v11 = vld [vmem:[%s820_s1 + $0x18] sm:$0xff]  ;;  %v26_v17 = vld [vmem:[%s820_s1 + $0x48] sm:$0xff] }
   0x3   :  { %v75_v6 = vunpack.c.1.s8 %v27_v0  ;;  %v76_v7 = vunpack.c.1.s8 %v28_v1  ;;  %v67_v8 = vunpack.c.0.s8 %v27_v0  ;;  %v68_v9 = vunpack.c.0.s8 %v28_v1  ;;  %v599_v38 = vld [vmem:[%s820_s1 + $0x70] sm:$0xff]  ;;  %v604_v39 = vld [vmem:[%s820_s1 + $0x78] sm:$0xff]  ;;  %v609_v46 = vld [vmem:[%s820_s1] sm:$0xff] }
   0x4   :  { %v155_v12 = vcvt.s32.f32 %v91_v2  ;;  %v156_v13 = vcvt.s32.f32 %v92_v3  ;;  %v147_v14 = vcvt.s32.f32 %v83_v4  ;;  %v148_v15 = vcvt.s32.f32 %v84_v5  ;;  %v614_v47 = vld [vmem:[%s820_s1 + $0x8] sm:$0xff]  ;;  %v627_v2 = vld [vmem:[%s821_s0] sm:$0xff] }
   0x5   :  { %v139_v18 = vcvt.s32.f32 %v75_v6  ;;  %v140_v19 = vcvt.s32.f32 %v76_v7  ;;  %v59_v20 = vunpack.c.3.s8 %v19_v10  ;;  %v60_v21 = vunpack.c.3.s8 %v20_v11 }
   0x6   :  { %244 = vmatpush.msra.mxu2 %v155_v12  ;;  %273 = vmatpush.msra.mxu3 %v156_v13  ;;  %v89_v22 = vunpack.c.3.s8 %v25_v16  ;;  %v90_v23 = vunpack.c.3.s8 %v26_v17  ;;  %v131_v24 = vcvt.s32.f32 %v67_v8  ;;  %v132_v25 = vcvt.s32.f32 %v68_v9 }
   0x7   :  { %v51_v26 = vunpack.c.2.s8 %v19_v10  ;;  %v52_v27 = vunpack.c.2.s8 %v20_v11  ;;  %v43_v28 = vunpack.c.1.s8 %v19_v10  ;;  %v44_v29 = vunpack.c.1.s8 %v20_v11 }
   0x8   :  { %245 = vmatpush.msra.mxu2 %v147_v14  ;;  %274 = vmatpush.msra.mxu3 %v148_v15  ;;  %v153_v30 = vcvt.s32.f32 %v89_v22  ;;  %v154_v31 = vcvt.s32.f32 %v90_v23  ;;  %v123_v32 = vcvt.s32.f32 %v59_v20  ;;  %v124_v33 = vcvt.s32.f32 %v60_v21  ;;  %v654_v23 = vld [vmem:[%s820_s1 + $0x30] sm:$0xff] }
   0x9   :  { %v81_v34 = vunpack.c.2.s8 %v25_v16  ;;  %v82_v35 = vunpack.c.2.s8 %v26_v17  ;;  %v35_v36 = vunpack.c.0.s8 %v19_v10  ;;  %v36_v37 = vunpack.c.0.s8 %v20_v11 }
   0xa   :  { %246 = vmatpush.msra.mxu2 %v139_v18  ;;  %275 = vmatpush.msra.mxu3 %v140_v19  ;;  %v73_v40 = vunpack.c.1.s8 %v25_v16  ;;  %v74_v41 = vunpack.c.1.s8 %v26_v17  ;;  %v115_v42 = vcvt.s32.f32 %v51_v26  ;;  %v116_v43 = vcvt.s32.f32 %v52_v27  ;;  %v647_v18 = vld [vmem:[%s820_s1 + $0x68] sm:$0xff] }
   0xb   :  { %186 = vmatpush.msra.mxu0 %v153_v30  ;;  %215 = vmatpush.msra.mxu1 %v154_v31  ;;  %v145_v44 = vcvt.s32.f32 %v81_v34  ;;  %v146_v45 = vcvt.s32.f32 %v82_v35  ;;  %v107_v48 = vcvt.s32.f32 %v43_v28  ;;  %v108_v49 = vcvt.s32.f32 %v44_v29 }
   0xc   :  { %247 = vmatpush.msra.mxu2 %v131_v24  ;;  %276 = vmatpush.msra.mxu3 %v132_v25  ;;  %v137_v50 = vcvt.s32.f32 %v73_v40  ;;  %v138_v51 = vcvt.s32.f32 %v74_v41  ;;  %v95_v52 = vunpack.c.3.s8 %v599_v38  ;;  %v96_v53 = vunpack.c.3.s8 %v604_v39  ;;  %v659_v24 = vld [vmem:[%s820_s1 + $0x38] sm:$0xff] }
   0xd   :  { %v65_v54 = vunpack.c.0.s8 %v25_v16  ;;  %v66_v55 = vunpack.c.0.s8 %v26_v17  ;;  %v99_v56 = vcvt.s32.f32 %v35_v36  ;;  %v100_v57 = vcvt.s32.f32 %v36_v37  ;;  %187 = vmatpush.msra.mxu0 %v145_v44  ;;  %216 = vmatpush.msra.mxu1 %v146_v45  ;;  %v642_v17 = vld [vmem:[%s820_s1 + $0x60] sm:$0xff] }
   0xe   :  { %248 = vmatpush.msra.mxu2 %v123_v32  ;;  %277 = vmatpush.msra.mxu3 %v124_v33  ;;  %v57_v58 = vunpack.c.3.s8 %v609_v46  ;;  %v58_v59 = vunpack.c.3.s8 %v614_v47  ;;  %v87_v62 = vunpack.c.2.s8 %v599_v38  ;;  %v88_v63 = vunpack.c.2.s8 %v604_v39  ;;  %v668_v33 = vld [vmem:[%s821_s0 + $0x8] sm:$0xff] }
   0xf   :  { %v129_v60 = vcvt.s32.f32 %v65_v54  ;;  %v130_v61 = vcvt.s32.f32 %v66_v55  ;;  %188 = vmatpush.msra.mxu0 %v137_v50  ;;  %217 = vmatpush.msra.mxu1 %v138_v51  ;;  %v49_v0 = vunpack.c.2.s8 %v609_v46  ;;  %v50_v1 = vunpack.c.2.s8 %v614_v47 }
  0x10   :  { %249 = vmatpush.msra.mxu2 %v115_v42  ;;  %278 = vmatpush.msra.mxu3 %v116_v43  ;;  %v159_v3 = vcvt.s32.f32 %v95_v52  ;;  %v160_v4 = vcvt.s32.f32 %v96_v53  ;;  %v79_v5 = vunpack.c.1.s8 %v599_v38  ;;  %v80_v6 = vunpack.c.1.s8 %v604_v39  ;;  %v21_v52 = vld [vmem:[%s820_s1 + $0x20] sm:$0xff]  ;;  %v22_v53 = vld [vmem:[%s820_s1 + $0x28] sm:$0xff] }
  0x11   :  { %189 = vmatpush.msra.mxu0 %v129_v60  ;;  %218 = vmatpush.msra.mxu1 %v130_v61  ;;  %v121_v7 = vcvt.s32.f32 %v57_v58  ;;  %v122_v8 = vcvt.s32.f32 %v58_v59  ;;  %v41_v9 = vunpack.c.1.s8 %v609_v46  ;;  %v42_v10 = vunpack.c.1.s8 %v614_v47  ;;  %v699_v60 = vld [vmem:[%s821_s0 + $0x10] sm:$0xff] }
  0x12   :  { %250 = vmatpush.msra.mxu2 %v107_v48  ;;  %279 = vmatpush.msra.mxu3 %v108_v49  ;;  %v151_v11 = vcvt.s32.f32 %v87_v62  ;;  %v152_v12 = vcvt.s32.f32 %v88_v63  ;;  %v71_v13 = vunpack.c.0.s8 %v599_v38  ;;  %v72_v14 = vunpack.c.0.s8 %v604_v39 }
  0x13   :  { %v113_v15 = vcvt.s32.f32 %v49_v0  ;;  %v114_v16 = vcvt.s32.f32 %v50_v1  ;;  %v143_v19 = vcvt.s32.f32 %v79_v5  ;;  %v144_v20 = vcvt.s32.f32 %v80_v6  ;;  %190 = vmatpush.msra.mxu0 %v121_v7  ;;  %219 = vmatpush.msra.mxu1 %v122_v8 }
  0x14   :  { %251 = vmatpush.msra.mxu2 %v99_v56  ;;  %280 = vmatpush.msra.mxu3 %v100_v57  ;;  %v33_v21 = vunpack.c.0.s8 %v609_v46  ;;  %v34_v22 = vunpack.c.0.s8 %v614_v47  ;;  %v105_v25 = vcvt.s32.f32 %v41_v9  ;;  %v106_v26 = vcvt.s32.f32 %v42_v10 }
  0x15   :  { %494 = vmatmul.msk.f32.vlgmr.msra.gmra.mxu2 %vm165_vm0, %v627_v2  ;;  %498 = vmatmul.msk.f32.vlgmr.msra.gmra.mxu3 %vm165_vm0, %v627_v2  ;;  %v135_v27 = vcvt.s32.f32 %v71_v13  ;;  %v136_v28 = vcvt.s32.f32 %v72_v14  ;;  %v93_v29 = vunpack.c.3.s8 %v642_v17  ;;  %v94_v30 = vunpack.c.3.s8 %v647_v18 }
  0x16   :  { %360 = vmatpush.msrb.mxu2 %v159_v3  ;;  %389 = vmatpush.msrb.mxu3 %v160_v4  ;;  %v63_v31 = vunpack.c.3.s8 %v654_v23  ;;  %v64_v32 = vunpack.c.3.s8 %v659_v24  ;;  %v97_v34 = vcvt.s32.f32 %v33_v21  ;;  %v98_v35 = vcvt.s32.f32 %v34_v22 }
  0x17   :  { %191 = vmatpush.msra.mxu0 %v113_v15  ;;  %220 = vmatpush.msra.mxu1 %v114_v16  ;;  %v85_v36 = vunpack.c.2.s8 %v642_v17  ;;  %v86_v37 = vunpack.c.2.s8 %v647_v18  ;;  %v55_v38 = vunpack.c.2.s8 %v654_v23  ;;  %v56_v39 = vunpack.c.2.s8 %v659_v24  ;;  %v164_v16 = vld [vmem:[%s821_s0 + $0x18] sm:$0xff] }
  0x18   :  { %361 = vmatpush.msrb.mxu2 %v151_v11  ;;  %390 = vmatpush.msrb.mxu3 %v152_v12  ;;  %v157_v40 = vcvt.s32.f32 %v93_v29  ;;  %v158_v41 = vcvt.s32.f32 %v94_v30  ;;  %v77_v42 = vunpack.c.1.s8 %v642_v17  ;;  %v78_v43 = vunpack.c.1.s8 %v647_v18 }
  0x19   :  { %192 = vmatpush.msra.mxu0 %v105_v25  ;;  %221 = vmatpush.msra.mxu1 %v106_v26  ;;  %v127_v44 = vcvt.s32.f32 %v63_v31  ;;  %v128_v45 = vcvt.s32.f32 %v64_v32  ;;  %v149_v46 = vcvt.s32.f32 %v85_v36  ;;  %v150_v47 = vcvt.s32.f32 %v86_v37 }
  0x1a   :  { %362 = vmatpush.msrb.mxu2 %v143_v19  ;;  %391 = vmatpush.msrb.mxu3 %v144_v20  ;;  %v47_v48 = vunpack.c.1.s8 %v654_v23  ;;  %v48_v49 = vunpack.c.1.s8 %v659_v24  ;;  %v119_v50 = vcvt.s32.f32 %v55_v38  ;;  %v120_v51 = vcvt.s32.f32 %v56_v39 }
  0x1b   :  { %193 = vmatpush.msra.mxu0 %v97_v34  ;;  %222 = vmatpush.msra.mxu1 %v98_v35  ;;  %v141_v54 = vcvt.s32.f32 %v77_v42  ;;  %v142_v55 = vcvt.s32.f32 %v78_v43  ;;  %v69_v56 = vunpack.c.0.s8 %v642_v17  ;;  %v70_v57 = vunpack.c.0.s8 %v647_v18 }
  0x1c   :  { %363 = vmatpush.msrb.mxu2 %v135_v27  ;;  %392 = vmatpush.msrb.mxu3 %v136_v28  ;;  %v39_v58 = vunpack.c.0.s8 %v654_v23  ;;  %v40_v59 = vunpack.c.0.s8 %v659_v24  ;;  %v111_v61 = vcvt.s32.f32 %v47_v48  ;;  %v112_v62 = vcvt.s32.f32 %v48_v49 }
  0x1d   :  { %495 = vmatmul.msk.f32.gmra.mxu2 %vm165_vm0, %v668_v33  ;;  %499 = vmatmul.msk.f32.gmra.mxu3 %vm165_vm0, %v668_v33  ;;  %v61_v63 = vunpack.c.3.s8 %v21_v52  ;;  %v62_v0 = vunpack.c.3.s8 %v22_v53  ;;  %v133_v1 = vcvt.s32.f32 %v69_v56  ;;  %v134_v3 = vcvt.s32.f32 %v70_v57  ;;  %v413_v56 = vld [vmem:[%s823_s3 + $0x8] sm:$0xff] }
  0x1e   :  { %486 = vmatmul.msk.f32.vlgmr.msra.gmra.mxu0 %vm165_vm0, %v627_v2  ;;  %490 = vmatmul.msk.f32.vlgmr.msra.gmra.mxu1 %vm165_vm0, %v627_v2  ;;  %v53_v4 = vunpack.c.2.s8 %v21_v52  ;;  %v54_v5 = vunpack.c.2.s8 %v22_v53  ;;  %v103_v6 = vcvt.s32.f32 %v39_v58  ;;  %v104_v7 = vcvt.s32.f32 %v40_v59 }
  0x1f   :  { %302 = vmatpush.msrb.mxu0 %v157_v40  ;;  %331 = vmatpush.msrb.mxu1 %v158_v41  ;;  %v125_v8 = vcvt.s32.f32 %v61_v63  ;;  %v126_v9 = vcvt.s32.f32 %v62_v0  ;;  %v45_v10 = vunpack.c.1.s8 %v21_v52  ;;  %v46_v11 = vunpack.c.1.s8 %v22_v53 }
  0x20   :  { %364 = vmatpush.msrb.mxu2 %v127_v44  ;;  %393 = vmatpush.msrb.mxu3 %v128_v45  ;;  %v117_v12 = vcvt.s32.f32 %v53_v4  ;;  %v118_v13 = vcvt.s32.f32 %v54_v5  ;;  %v37_v14 = vunpack.c.0.s8 %v21_v52  ;;  %v38_v15 = vunpack.c.0.s8 %v22_v53  ;;  %v410_v52 = vld [vmem:[%s822_s2] sm:$0xff]  ;;  %v411_v53 = vld [vmem:[%s822_s2 + $0x8] sm:$0xff] }
  0x21   :  { %303 = vmatpush.msrb.mxu0 %v149_v46  ;;  %332 = vmatpush.msrb.mxu1 %v150_v47  ;;  %v109_v17 = vcvt.s32.f32 %v45_v10  ;;  %v110_v18 = vcvt.s32.f32 %v46_v11 }
  0x22   :  { %365 = vmatpush.msrb.mxu2 %v119_v50  ;;  %394 = vmatpush.msrb.mxu3 %v120_v51  ;;  %v101_v19 = vcvt.s32.f32 %v37_v14  ;;  %v102_v20 = vcvt.s32.f32 %v38_v15 }
  0x23   :  { %304 = vmatpush.msrb.mxu0 %v141_v54  ;;  %333 = vmatpush.msrb.mxu1 %v142_v55  ;;  %v412_v54 = vld [vmem:[%s823_s3] sm:$0xff]  ;;  %v552_v55 = vmov 0  }
  0x24   :  { %366 = vmatpush.msrb.mxu2 %v111_v61  ;;  %395 = vmatpush.msrb.mxu3 %v112_v62 }
  0x25   :  { %496 = vmatmul.msk.f32.gmra.mxu2 %vm165_vm0, %v699_v60  ;;  %500 = vmatmul.msk.f32.gmra.mxu3 %vm165_vm0, %v699_v60 }
  0x26   :  { %487 = vmatmul.msk.f32.gmra.mxu0 %vm165_vm0, %v668_v33  ;;  %491 = vmatmul.msk.f32.gmra.mxu1 %vm165_vm0, %v668_v33 }
  0x27   :  { %305 = vmatpush.msrb.mxu0 %v133_v1  ;;  %334 = vmatpush.msrb.mxu1 %v134_v3 }
  0x28   :  { %367 = vmatpush.msrb.mxu2 %v103_v6  ;;  %396 = vmatpush.msrb.mxu3 %v104_v7 }
  0x29   :  { %306 = vmatpush.msrb.mxu0 %v125_v8  ;;  %335 = vmatpush.msrb.mxu1 %v126_v9 }
  0x2a   :  { %551 = vset.pattern.permute.xlu0 %v552_v55 }
  0x2b   :  { %307 = vmatpush.msrb.mxu0 %v117_v12  ;;  %336 = vmatpush.msrb.mxu1 %v118_v13 }
  0x2c   :  { %416 = vperm.xlu0 %551, %v412_v54  }
  0x2d   :  { %497 = vmatmul.msk.f32.gmra.mxu2 %vm165_vm0, %v164_v16  ;;  %501 = vmatmul.msk.f32.gmra.mxu3 %vm165_vm0, %v164_v16 }
  0x2e   :  { %308 = vmatpush.msrb.mxu0 %v109_v17  ;;  %337 = vmatpush.msrb.mxu1 %v110_v18 }
  0x2f   :  { %488 = vmatmul.msk.f32.gmra.mxu0 %vm165_vm0, %v699_v60  ;;  %492 = vmatmul.msk.f32.gmra.mxu1 %vm165_vm0, %v699_v60 }
  0x30   :  { %309 = vmatpush.msrb.mxu0 %v101_v19  ;;  %338 = vmatpush.msrb.mxu1 %v102_v20 }
  0x34   :  { %421 = vperm.xlu0 %551, %v413_v56  }
  0x35   :  { %510 = vmatmul.msk.f32.vlgmr.msrb.gmra.mxu2 %vm165_vm0, %v627_v2  ;;  %514 = vmatmul.msk.f32.vlgmr.msrb.gmra.mxu3 %vm165_vm0, %v627_v2 }
  0x37   :  { %489 = vmatmul.msk.f32.gmra.mxu0 %vm165_vm0, %v164_v16  ;;  %493 = vmatmul.msk.f32.gmra.mxu1 %vm165_vm0, %v164_v16 }
  0x3d   :  { %511 = vmatmul.msk.f32.gmra.mxu2 %vm165_vm0, %v668_v33  ;;  %515 = vmatmul.msk.f32.gmra.mxu3 %vm165_vm0, %v668_v33 }
  0x3f   :  { %502 = vmatmul.msk.f32.vlgmr.msrb.gmra.mxu0 %vm165_vm0, %v627_v2  ;;  %506 = vmatmul.msk.f32.vlgmr.msrb.gmra.mxu1 %vm165_vm0, %v627_v2 }
  0x45   :  { %512 = vmatmul.msk.f32.gmra.mxu2 %vm165_vm0, %v699_v60  ;;  %516 = vmatmul.msk.f32.gmra.mxu3 %vm165_vm0, %v699_v60 }
  0x47   :  { %503 = vmatmul.msk.f32.gmra.mxu0 %vm165_vm0, %v668_v33  ;;  %507 = vmatmul.msk.f32.gmra.mxu1 %vm165_vm0, %v668_v33 }
  0x4d   :  { %513 = vmatmul.msk.f32.gmra.mxu2 %vm165_vm0, %v164_v16  ;;  %517 = vmatmul.msk.f32.gmra.mxu3 %vm165_vm0, %v164_v16 }
  0x4f   :  { %504 = vmatmul.msk.f32.gmra.mxu0 %vm165_vm0, %v699_v60  ;;  %508 = vmatmul.msk.f32.gmra.mxu1 %vm165_vm0, %v699_v60 }
  0x57   :  { %505 = vmatmul.msk.f32.gmra.mxu0 %vm165_vm0, %v164_v16  ;;  %509 = vmatmul.msk.f32.gmra.mxu1 %vm165_vm0, %v164_v16 }
  0x98   :  { %v748_v2 = vpop.f32.mrf.mxu2  ;;  %v750_v21 = vpop.f32.mrf.mxu3 }
  0x9b   :  { %v752_v22 = vpop.f32.mrf.mxu0  ;;  %v754_v23 = vpop.f32.mrf.mxu1 }
  0x9e   :  { %v417_v57 = vpop.permute.xlu0 %416 }
  0xa0   :  { %v756_v24 = vpop.f32.mrf.mxu2  ;;  %v758_v25 = vpop.f32.mrf.mxu3 }
  0xa3   :  { %v760_v26 = vpop.f32.mrf.mxu0  ;;  %v762_v27 = vpop.f32.mrf.mxu1 }
  0xa6   :  { %v422_v1 = vpop.permute.xlu0 %421 }
  0xa8   :  { %v259_v28 = vpop.f32.mrf.mxu2  ;;  %v288_v29 = vpop.f32.mrf.mxu3 }
  0xac   :  { %v764_v30 = vpop.f32.mrf.mxu0  ;;  %v766_v31 = vpop.f32.mrf.mxu1 }
  0xb0   :  { %v262_v32 = vpop.f32.mrf.mxu2  ;;  %v291_v33 = vpop.f32.mrf.mxu3 }
  0xb4   :  { %v768_v34 = vpop.f32.mrf.mxu0  ;;  %v770_v35 = vpop.f32.mrf.mxu1 }
  0xb8   :  { %v369_v36 = vpop.f32.mrf.mxu2  ;;  %v398_v37 = vpop.f32.mrf.mxu3 }
  0xbc   :  { %v311_v38 = vpop.f32.mrf.mxu0  ;;  %v340_v39 = vpop.f32.mrf.mxu1 }
  0xc0   :  { %v372_v40 = vpop.f32.mrf.mxu2  ;;  %v401_v41 = vpop.f32.mrf.mxu3 }
  0xc4   :  { %v314_v42 = vpop.f32.mrf.mxu0  ;;  %v343_v43 = vpop.f32.mrf.mxu1 }
  0xc8   :  { %v375_v44 = vpop.f32.mrf.mxu2  ;;  %v404_v45 = vpop.f32.mrf.mxu3 }
  0xcc   :  { %v317_v46 = vpop.f32.mrf.mxu0  ;;  %v346_v47 = vpop.f32.mrf.mxu1 }
  0xd0   :  { %v378_v48 = vpop.f32.mrf.mxu2  ;;  %v407_v49 = vpop.f32.mrf.mxu3 }
  0xd1   :  { %424 = vmatpush.msra.mxu0 %v378_v48  ;;  %518 = vmatpush.msra.mxu2 %v378_v48 }
  0xd2   :  { %447 = vmatpush.msra.mxu1 %v407_v49  ;;  %534 = vmatpush.msra.mxu3 %v407_v49 }
  0xd3   :  { %425 = vmatpush.msra.mxu0 %v375_v44  ;;  %519 = vmatpush.msra.mxu2 %v375_v44 }
  0xd4   :  { %448 = vmatpush.msra.mxu1 %v404_v45  ;;  %535 = vmatpush.msra.mxu3 %v404_v45  ;;  %v320_v50 = vpop.f32.mrf.mxu0  ;;  %v349_v51 = vpop.f32.mrf.mxu1 }
  0xd5   :  { %426 = vmatpush.msra.mxu0 %v372_v40  ;;  %520 = vmatpush.msra.mxu2 %v372_v40 }
  0xd6   :  { %449 = vmatpush.msra.mxu1 %v401_v41  ;;  %536 = vmatpush.msra.mxu3 %v401_v41 }
  0xd7   :  { %427 = vmatpush.msra.mxu0 %v369_v36  ;;  %521 = vmatpush.msra.mxu2 %v369_v36 }
  0xd8   :  { %450 = vmatpush.msra.mxu1 %v398_v37  ;;  %537 = vmatpush.msra.mxu3 %v398_v37 }
  0xd9   :  { %428 = vmatpush.msra.mxu0 %v320_v50  ;;  %522 = vmatpush.msra.mxu2 %v320_v50 }
  0xda   :  { %451 = vmatpush.msra.mxu1 %v349_v51  ;;  %538 = vmatpush.msra.mxu3 %v349_v51 }
  0xdb   :  { %429 = vmatpush.msra.mxu0 %v317_v46  ;;  %523 = vmatpush.msra.mxu2 %v317_v46 }
  0xdc   :  { %452 = vmatpush.msra.mxu1 %v346_v47  ;;  %539 = vmatpush.msra.mxu3 %v346_v47 }
  0xdd   :  { %430 = vmatpush.msra.mxu0 %v314_v42  ;;  %524 = vmatpush.msra.mxu2 %v314_v42 }
  0xde   :  { %453 = vmatpush.msra.mxu1 %v343_v43  ;;  %540 = vmatpush.msra.mxu3 %v343_v43 }
  0xdf   :  { %431 = vmatpush.msra.mxu0 %v311_v38  ;;  %525 = vmatpush.msra.mxu2 %v311_v38 }
  0xe0   :  { %454 = vmatpush.msra.mxu1 %v340_v39  ;;  %541 = vmatpush.msra.mxu3 %v340_v39 }
  0xe1   :  { %432 = vmatpush.msra.mxu0 %v262_v32  ;;  %526 = vmatpush.msra.mxu2 %v262_v32 }
  0xe2   :  { %455 = vmatpush.msra.mxu1 %v291_v33  ;;  %542 = vmatpush.msra.mxu3 %v291_v33 }
  0xe3   :  { %433 = vmatpush.msra.mxu0 %v259_v28  ;;  %527 = vmatpush.msra.mxu2 %v259_v28 }
  0xe4   :  { %456 = vmatpush.msra.mxu1 %v288_v29  ;;  %543 = vmatpush.msra.mxu3 %v288_v29 }
  0xe5   :  { %434 = vmatpush.msra.mxu0 %v756_v24  ;;  %528 = vmatpush.msra.mxu2 %v756_v24 }
  0xe6   :  { %457 = vmatpush.msra.mxu1 %v758_v25  ;;  %544 = vmatpush.msra.mxu3 %v758_v25 }
  0xe7   :  { %435 = vmatpush.msra.mxu0 %v748_v2  ;;  %529 = vmatpush.msra.mxu2 %v748_v2 }
  0xe8   :  { %458 = vmatpush.msra.mxu1 %v750_v21  ;;  %545 = vmatpush.msra.mxu3 %v750_v21 }
  0xe9   :  { %436 = vmatpush.msra.mxu0 %v768_v34  ;;  %530 = vmatpush.msra.mxu2 %v768_v34 }
  0xea   :  { %459 = vmatpush.msra.mxu1 %v770_v35  ;;  %546 = vmatpush.msra.mxu3 %v770_v35 }
  0xeb   :  { %437 = vmatpush.msra.mxu0 %v764_v30  ;;  %531 = vmatpush.msra.mxu2 %v764_v30 }
  0xec   :  { %460 = vmatpush.msra.mxu1 %v766_v31  ;;  %547 = vmatpush.msra.mxu3 %v766_v31 }
  0xed   :  { %438 = vmatpush.msra.mxu0 %v760_v26  ;;  %532 = vmatpush.msra.mxu2 %v760_v26 }
  0xee   :  { %461 = vmatpush.msra.mxu1 %v762_v27  ;;  %548 = vmatpush.msra.mxu3 %v762_v27 }
  0xef   :  { %439 = vmatpush.msra.mxu0 %v752_v22  ;;  %533 = vmatpush.msra.mxu2 %v752_v22 }
  0xf0   :  { %462 = vmatpush.msra.mxu1 %v754_v23  ;;  %549 = vmatpush.msra.mxu3 %v754_v23 }
  0xf1   :  { %440 = vmatmul.f32.vlgmr.msra.gmra.mxu0 %v410_v52  ;;  %443 = vmatmul.f32.vlgmr.msra.gmra.mxu2 %v411_v53 }
  0xf2   :  { %463 = vmatmul.f32.vlgmr.msra.gmra.mxu1 %v410_v52  ;;  %466 = vmatmul.f32.vlgmr.msra.gmra.mxu3 %v411_v53 }
 0x16e   :  { %v441_v58 = vpop.f32.mrf.mxu0 }
 0x16f   :  { %v442_v59 = vadd.f32 %v441_v58, %v417_v57  ;;  %v464_v60 = vpop.f32.mrf.mxu1 }
 0x170   :  { %v465_v61 = vadd.f32 %v464_v60, %v417_v57 }
 0x171   :  { %v470_v62 = vmul.f32 0.5, %v442_v59 }
 0x172   :  { %v471_v63 = vmul.f32 0.5, %v465_v61 }
 0x173   :  { %v474_v0 = vmax.f32 %v442_v59, %v470_v62 }
 0x174   :  { %v475_v3 = vmax.f32 %v465_v61, %v471_v63  ;;  %v444_v4 = vpop.f32.mrf.mxu2 }
 0x175   :  { %478 = vst [vmem:[%s824_s4] sm:$0xff] %v474_v0  ;;  %v445_v5 = vadd.f32 %v444_v4, %v422_v1  ;;  %v467_v6 = vpop.f32.mrf.mxu3 }
 0x176   :  { %479 = vst [vmem:[%s824_s4 + $0x8] sm:$0xff] %v475_v3  ;;  %v468_v7 = vadd.f32 %v467_v6, %v422_v1 }
 0x177   :  { %v472_v8 = vmul.f32 0.5, %v445_v5 }
 0x178   :  { %v473_v9 = vmul.f32 0.5, %v468_v7 }
 0x179   :  { %v476_v10 = vmax.f32 %v445_v5, %v472_v8 }
 0x17a   :  { %v477_v11 = vmax.f32 %v468_v7, %v473_v9 }
 0x17b   :  { %480 = vst [vmem:[%s824_s4 + $0x10] sm:$0xff] %v476_v10 }
 0x17c   :  { %481 = vst [vmem:[%s824_s4 + $0x18] sm:$0xff] %v477_v11 }

</bundles_post_ra>
